<compile_context>
chip_gen: v5e
topology: v5e:2x2
jax: 0.10.0
libtpu: 0.0.40
codegen_flags: <defaults>
</compile_context>

<pallas_src>
import functools

import jax
import jax.numpy as jnp
from jax.experimental import pallas as pl
from jax.experimental.pallas import tpu as pltpu

BN_EPS = 1e-4
# BatchNorm1d in eval with running_mean=0, running_var=1, weight=1, bias=0
# (set_bn_init) reduces to a single positive scalar scale, folded into weights.
BN_SCALE = 1.0 / (1.0 + BN_EPS) ** 0.5


def _heads_kernel(x_ref, w1_ref, b1_ref, w2_ref, b2_ref, out_ref, *, two_m):
    """Fused per-row heads.

    x_ref : (tile_n, m)                UNet output features (pre output_layer)
    w1_ref: (m, 2m + out_w)  bf16      [reg trunk | off trunk | sem | size | 0(9)]
    b1_ref: (1, 2m + out_w)  f32
    w2_ref: (2m, out_w)      bf16      [0(classes+6) | r1 | r2 | offset]  (block-diag)
    b2_ref: (1, out_w)       f32
    out   : (tile_n, out_w)  f32       [sem | size | r1 | r2 | offset]
    """
    # output_layer: eval BN (scale folded into w1) + ReLU. Keep elementwise math
    # in f32 (v5e VPU has no bf16 ALU); cast to bf16 only at the MXU inputs.
    x = jnp.maximum(x_ref[...].astype(jnp.float32), 0.0)

    # Fused stage-1 matmul (one bf16 MXU push instead of four f32 pushes).
    h1 = jnp.dot(x.astype(jnp.bfloat16), w1_ref[...],
                 preferred_element_type=jnp.float32) + b1_ref[...]

    # Trunk BN (folded into w2) + ReLU. Trunk lanes [0, 2m): lane-0-aligned
    # slice feeding the dependent second MXU push (no pre-MXU lane shuffle).
    trunk = jnp.maximum(h1[:, :two_m], 0.0)

    # Fused stage-2 matmul (block-diagonal, zero-padded to the output width).
    h2 = jnp.dot(trunk.astype(jnp.bfloat16), w2_ref[...],
                 preferred_element_type=jnp.float32) + b2_ref[...]

    # h1[:, 2m:] = [sem | size | 0...] and h2 = [0... | r1 | r2 | off]:
    # one add, one lane-packed store — no concat / roll / masking.
    out_ref[...] = h2 + h1[:, two_m:]


def rpgn_heads_pallas(feats, packed, *, tile_n=4096):
    """Fused head computation. feats: (rows, m) float. Returns (rows, classes+15) f32."""
    n, m = feats.shape
    classes = packed["classes"]
    d_head = classes + 6
    out_w = d_head + 9          # classes + 6 + 3 + 3 + 3
    two_m = 2 * m
    assert out_w <= 128, "lane-packed output slab must fit one vreg width"
    assert packed["w1"].shape == (m, two_m + out_w)
    assert packed["w2"].shape == (two_m, out_w)

    # Tile selection: large tiles amortize the ~0.35us/step fixed overhead, but
    # keep >= 2 grid steps so both v7x TensorCores get work. No jnp.pad / out[:n]
    # round-trip: the pipeline clamps the ragged last block and OOB rows are
    # never written back.
    half = max(8, ((pl.cdiv(n, 2) + 7) // 8) * 8)
    tile_n = max(8, min((tile_n // 8) * 8, half))
    grid = (pl.cdiv(n, tile_n),)

    w1, b1, w2, b2 = packed["w1"], packed["b1"], packed["w2"], packed["b2"]

    kernel = functools.partial(_heads_kernel, two_m=two_m)
    full = lambda a: pl.BlockSpec(a.shape, lambda i: (0, 0))

    flops = 2 * n * m * (two_m + out_w) + 2 * n * two_m * out_w
    bytes_accessed = (
        int(feats.size) * feats.dtype.itemsize
        + n * out_w * 4
        + sum(int(a.size) * a.dtype.itemsize for a in (w1, b1, w2, b2))
    )

    return pl.pallas_call(
        kernel,
        out_shape=jax.ShapeDtypeStruct((n, out_w), jnp.float32),
        grid_spec=pltpu.PrefetchScalarGridSpec(
            num_scalar_prefetch=0,
            grid=grid,
            in_specs=[
                pl.BlockSpec((tile_n, m), lambda i: (i, 0)),
                full(w1), full(b1),
                full(w2), full(b2),
            ],
            out_specs=pl.BlockSpec((tile_n, out_w), lambda i: (i, 0)),
        ),
        compiler_params=pltpu.CompilerParams(
            dimension_semantics=("parallel",),
            vmem_limit_bytes=32 * 1024 * 1024,
        ),
        cost_estimate=pl.CostEstimate(
            flops=int(flops), transcendentals=0, bytes_accessed=int(bytes_accessed)),
    )(feats, w1, b1, w2, b2)


def init_params(key, m, classes):
    """Deterministic synthetic params (PyTorch Linear shapes, stored (in, out))."""
    ks = jax.random.split(key, 7)

    def lin(k, fan_in, fan_out):
        kw, kb = jax.random.split(k)
        bound = 1.0 / (fan_in ** 0.5)
        w = jax.random.uniform(kw, (fan_in, fan_out), jnp.float32, -bound, bound)
        b = jax.random.uniform(kb, (1, fan_out), jnp.float32, -bound, bound)
        return w, b

    w_sem, b_sem = lin(ks[0], m, classes)   # semantic_linear
    w_reg, b_reg = lin(ks[1], m, m)         # regional[0]
    w_r1, b_r1 = lin(ks[2], m, 3)           # regional_linear1
    w_r2, b_r2 = lin(ks[3], m, 3)           # regional_linear2
    w_size, b_size = lin(ks[4], m, 6)       # size_linear
    w_off, b_off = lin(ks[5], m, m)         # offset[0]
    w_offl, b_offl = lin(ks[6], m, 3)       # offset_linear
    return dict(
        w_sem=w_sem, b_sem=b_sem, w_reg=w_reg, b_reg=b_reg,
        w_r1=w_r1, b_r1=b_r1, w_r2=w_r2, b_r2=b_r2,
        w_size=w_size, b_size=b_size, w_off=w_off, b_off=b_off,
        w_offl=w_offl, b_offl=b_offl,
    )


def pack_params(params, m, classes):
    """One-time host-side packing: fuse weights, fold BN scales, lane-align.

    ReLU(x * s) @ W == ReLU(x) @ (s * W) for s > 0, so the eval-BN scale of
    output_layer folds into the stage-1 weights and the trunk-BN scale folds
    into the stage-2 weights. Biases are unscaled (they sit after the BN'd input).

    Column layout is chosen so the kernel never concatenates:
      w1 cols = [reg trunk (m) | off trunk (m) | sem (classes) | size (6) | 0 (9)]
      w2 cols = [0 (classes+6) | r1 (3) | r2 (3) | offset (3)]   (block-diag rows)
    so  out = (trunk @ w2 + b2) + h1[:, 2m:]  is exact.
    """
    d_head = classes + 6
    out_w = d_head + 9
    assert out_w <= 128, "packing assumes the slab fits one vreg width"
    s = jnp.float32(BN_SCALE)

    # Stage-1 fused weight (MXU sees bf16; f32 folding happens first).
    w1 = s * jnp.concatenate(
        [params["w_reg"], params["w_off"], params["w_sem"], params["w_size"],
         jnp.zeros((m, 9), jnp.float32)], axis=1)
    b1 = jnp.concatenate(
        [params["b_reg"], params["b_off"], params["b_sem"], params["b_size"],
         jnp.zeros((1, 9), jnp.float32)], axis=1)

    # Stage-2 block-diagonal weight over [reg trunk ; off trunk], left-padded with
    # d_head zero columns so its result lands directly at the output lane offset.
    z_m3 = jnp.zeros((m, 3), jnp.float32)
    z_md = jnp.zeros((m, d_head), jnp.float32)
    top = jnp.concatenate([z_md, params["w_r1"], params["w_r2"], z_m3], axis=1)
    bot = jnp.concatenate([z_md, z_m3, z_m3, params["w_offl"]], axis=1)
    w2 = s * jnp.concatenate([top, bot], axis=0)
    b2 = jnp.concatenate(
        [jnp.zeros((1, d_head), jnp.float32),
         params["b_r1"], params["b_r2"], params["b_offl"]], axis=1)

    return dict(
        w1=w1.astype(jnp.bfloat16), b1=b1,       # bf16 MXU inputs, f32 biases
        w2=w2.astype(jnp.bfloat16), b2=b2,
        classes=classes, m=m,
    )


def rpgn_forward(unet_out_feats, input_map, packed):
    """Forward pass for epoch <= prepare_epochs.

    unet_out_feats: (N_vox, m) float — spconv UNet output voxel features
                    (TODO(synk): the sparse-conv backbone itself is not translatable).
    input_map:      (N,) int32 — voxel-to-point map.
    """
    # All head math is per-row, so it commutes with output.features[input_map]:
    # run the fused kernel on voxels and gather only the narrow output slab —
    # this avoids materializing an (N, m) intermediate in HBM.
    slab_vox = rpgn_heads_pallas(unet_out_feats, packed)
    slab = jnp.take(slab_vox, input_map, axis=0)

    c = packed["classes"]
    ret = {
        "semantic_scores": slab[:, 0:c],
        "size_scores": slab[:, c:c + 6],
        "regional_scores": slab[:, c + 6:c + 9],
        "regional_scores2": slab[:, c + 9:c + 12],
        "pt_offsets": slab[:, c + 12:c + 15],
    }
    # (argmax preds are only consumed by the skipped clustering branch)
    return ret


def _reference_packed(unet_out_feats, input_map, packed):
    """Pure-JAX replica of the fused/bf16 kernel math (same packed weights)."""
    two_m = 2 * packed["m"]
    x = jnp.maximum(unet_out_feats.astype(jnp.float32), 0.0)
    h1 = jnp.dot(x.astype(jnp.bfloat16), packed["w1"],
                 preferred_element_type=jnp.float32) + packed["b1"]
    trunk = jnp.maximum(h1[:, :two_m], 0.0)
    h2 = jnp.dot(trunk.astype(jnp.bfloat16), packed["w2"],
                 preferred_element_type=jnp.float32) + packed["b2"]
    slab = h2 + h1[:, two_m:]
    return jnp.take(slab, input_map, axis=0)


def _reference_f32(unet_out_feats, input_map, params):
    """Pure-JAX f32 reference with the original un-fused parameters."""
    x = jnp.take(unet_out_feats, input_map, axis=0)
    x = jnp.maximum(x * BN_SCALE, 0.0)
    sem = x @ params["w_sem"] + params["b_sem"]
    h_reg = jnp.maximum((x @ params["w_reg"] + params["b_reg"]) * BN_SCALE, 0.0)
    reg1 = h_reg @ params["w_r1"] + params["b_r1"]
    reg2 = h_reg @ params["w_r2"] + params["b_r2"]
    size = x @ params["w_size"] + params["b_size"]
    h_off = jnp.maximum((x @ params["w_off"] + params["b_off"]) * BN_SCALE, 0.0)
    off = h_off @ params["w_offl"] + params["b_offl"]
    return sem, reg1, reg2, size, off


if __name__ == "__main__":
    key = jax.random.PRNGKey(0)
    m = 32          # cfg.m
    classes = 8     # cfg.classes
    n_vox = 192     # active voxels out of the UNet
    n_pts = 256     # input points

    k_feat, k_map, k_par = jax.random.split(key, 3)
    unet_out_feats = jax.random.normal(k_feat, (n_vox, m), jnp.float32)
    input_map = jax.random.randint(k_map, (n_pts,), 0, n_vox, jnp.int32)
    params = init_params(k_par, m, classes)
    packed = pack_params(params, m, classes)

    ret = rpgn_forward(unet_out_feats, input_map, packed)
    jax.block_until_ready(ret)

    c = classes

    # Tight check vs a pure-JAX replica of the kernel math (same bf16 packing).
    slab_ref = _reference_packed(unet_out_feats, input_map, packed)
    packed_refs = {
        "semantic_scores": slab_ref[:, 0:c],
        "size_scores": slab_ref[:, c:c + 6],
        "regional_scores": slab_ref[:, c + 6:c + 9],
        "regional_scores2": slab_ref[:, c + 9:c + 12],
        "pt_offsets": slab_ref[:, c + 12:c + 15],
    }
    for name, r in packed_refs.items():
        assert jnp.allclose(ret[name], r, atol=1e-4, rtol=1e-4), f"packed ref mismatch: {name}"

    # Loose sanity check vs the original un-fused f32 math (bf16 MXU inputs).
    sem, reg1, reg2, size, off = _reference_f32(unet_out_feats, input_map, params)
    f32_refs = {
        "semantic_scores": sem,
        "regional_scores": reg1,
        "regional_scores2": reg2,
        "size_scores": size,
        "pt_offsets": off,
    }
    for name, r in f32_refs.items():
        assert jnp.allclose(ret[name], r, atol=3e-2, rtol=3e-2), f"f32 ref mismatch: {name}"

    print("KERNEL_OK")
</pallas_src>

<mosaic_0001>
module attributes {stable_mosaic.version = 11 : i64} {
  func.func @_heads_kernel(%arg0: i32, %arg1: memref<96x32xf32, #tpu.memory_space<vmem>>, %arg2: memref<32x87xbf16, #tpu.memory_space<vmem>>, %arg3: memref<1x87xf32, #tpu.memory_space<vmem>>, %arg4: memref<64x23xbf16, #tpu.memory_space<vmem>>, %arg5: memref<1x23xf32, #tpu.memory_space<vmem>>, %arg6: memref<96x23xf32, #tpu.memory_space<vmem>>) attributes {dimension_semantics = [#tpu.dimension_semantics<parallel>], iteration_bounds = array<i64: 2>, scalar_prefetch = 0 : i64, scratch_operands = 0 : i64, tpu.core_type = #tpu.core_type<tc>, window_params = [{transform_indices = @transform_0, window_bounds = array<i64: 96, 32>}, {pipeline_mode = #tpu.pipeline_mode<synchronous>, transform_indices = @transform_1, window_bounds = array<i64: 32, 87>}, {pipeline_mode = #tpu.pipeline_mode<synchronous>, transform_indices = @transform_2, window_bounds = array<i64: 1, 87>}, {pipeline_mode = #tpu.pipeline_mode<synchronous>, transform_indices = @transform_3, window_bounds = array<i64: 64, 23>}, {pipeline_mode = #tpu.pipeline_mode<synchronous>, transform_indices = @transform_4, window_bounds = array<i64: 1, 23>}, {transform_indices = @transform_5, window_bounds = array<i64: 96, 23>}]} {
    %c0 = arith.constant 0 : index
    %c0_0 = arith.constant 0 : index
    %0 = vector.load %arg1[%c0, %c0_0] : memref<96x32xf32, #tpu.memory_space<vmem>>, vector<96x32xf32>
    %cst = arith.constant 0.000000e+00 : f32
    %1 = vector.broadcast %cst : f32 to vector<96x32xf32>
    %2 = arith.maximumf %0, %1 : vector<96x32xf32>
    %3 = arith.truncf %2 : vector<96x32xf32> to vector<96x32xbf16>
    %c0_1 = arith.constant 0 : index
    %c0_2 = arith.constant 0 : index
    %4 = vector.load %arg2[%c0_1, %c0_2] : memref<32x87xbf16, #tpu.memory_space<vmem>>, vector<32x87xbf16>
    %cst_3 = arith.constant dense<0.000000e+00> : vector<96x87xf32>
    %5 = tpu.matmul %3, %4, %cst_3 {dimension_numbers = #tpu.dot_dimension_numbers<[1], [0], [0], [1], [0, 0, 1, 1], [], []>} : vector<96x32xbf16>, vector<32x87xbf16>, vector<96x87xf32> -> vector<96x87xf32>
    %c0_4 = arith.constant 0 : index
    %c0_5 = arith.constant 0 : index
    %6 = vector.load %arg3[%c0_4, %c0_5] : memref<1x87xf32, #tpu.memory_space<vmem>>, vector<1x87xf32>
    %7 = vector.broadcast %6 : vector<1x87xf32> to vector<96x87xf32>
    %8 = arith.addf %5, %7 : vector<96x87xf32>
    %9 = vector.extract_strided_slice %8 {offsets = [0, 0], sizes = [96, 64], strides = [1, 1]} : vector<96x87xf32> to vector<96x64xf32>
    %cst_6 = arith.constant 0.000000e+00 : f32
    %10 = vector.broadcast %cst_6 : f32 to vector<96x64xf32>
    %11 = arith.maximumf %9, %10 : vector<96x64xf32>
    %12 = arith.truncf %11 : vector<96x64xf32> to vector<96x64xbf16>
    %c0_7 = arith.constant 0 : index
    %c0_8 = arith.constant 0 : index
    %13 = vector.load %arg4[%c0_7, %c0_8] : memref<64x23xbf16, #tpu.memory_space<vmem>>, vector<64x23xbf16>
    %cst_9 = arith.constant dense<0.000000e+00> : vector<96x23xf32>
    %14 = tpu.matmul %12, %13, %cst_9 {dimension_numbers = #tpu.dot_dimension_numbers<[1], [0], [0], [1], [0, 0, 1, 1], [], []>} : vector<96x64xbf16>, vector<64x23xbf16>, vector<96x23xf32> -> vector<96x23xf32>
    %c0_10 = arith.constant 0 : index
    %c0_11 = arith.constant 0 : index
    %15 = vector.load %arg5[%c0_10, %c0_11] : memref<1x23xf32, #tpu.memory_space<vmem>>, vector<1x23xf32>
    %16 = vector.broadcast %15 : vector<1x23xf32> to vector<96x23xf32>
    %17 = arith.addf %14, %16 : vector<96x23xf32>
    %18 = vector.extract_strided_slice %8 {offsets = [0, 64], sizes = [96, 23], strides = [1, 1]} : vector<96x87xf32> to vector<96x23xf32>
    %19 = arith.addf %17, %18 : vector<96x23xf32>
    %c0_12 = arith.constant 0 : index
    %c0_13 = arith.constant 0 : index
    %20 = vector.load %arg6[%c0_12, %c0_13] : memref<96x23xf32, #tpu.memory_space<vmem>>, vector<96x23xf32>
    tpu.vector_store %arg6[%c0_12, %c0_13], %19 {strides = array<i32>} : memref<96x23xf32, #tpu.memory_space<vmem>>, vector<96x23xf32>,
    return
  }
  func.func @transform_0(%arg0: i32) -> (i32, i32) {
    %c0_i32 = arith.constant 0 : i32
    %c0_i32_0 = arith.constant 0 : i32
    return %arg0, %c0_i32 : i32, i32
  }
  func.func @transform_1(%arg0: i32) -> (i32, i32) {
    %c0_i32 = arith.constant 0 : i32
    %c0_i32_0 = arith.constant 0 : i32
    %c0_i32_1 = arith.constant 0 : i32
    return %c0_i32, %c0_i32_0 : i32, i32
  }
  func.func @transform_2(%arg0: i32) -> (i32, i32) {
    %c0_i32 = arith.constant 0 : i32
    %c0_i32_0 = arith.constant 0 : i32
    %c0_i32_1 = arith.constant 0 : i32
    return %c0_i32, %c0_i32_0 : i32, i32
  }
  func.func @transform_3(%arg0: i32) -> (i32, i32) {
    %c0_i32 = arith.constant 0 : i32
    %c0_i32_0 = arith.constant 0 : i32
    %c0_i32_1 = arith.constant 0 : i32
    return %c0_i32, %c0_i32_0 : i32, i32
  }
  func.func @transform_4(%arg0: i32) -> (i32, i32) {
    %c0_i32 = arith.constant 0 : i32
    %c0_i32_0 = arith.constant 0 : i32
    %c0_i32_1 = arith.constant 0 : i32
    return %c0_i32, %c0_i32_0 : i32, i32
  }
  func.func @transform_5(%arg0: i32) -> (i32, i32) {
    %c0_i32 = arith.constant 0 : i32
    %c0_i32_0 = arith.constant 0 : i32
    return %arg0, %c0_i32 : i32, i32
  }
}

</mosaic_0001>

<bundles_post_ra>
// kernel: tpu_custom_call.1
= control target key start
LH: loop header
LB: loop body
LE: loop exit
PB: predicated region body
PF: predicated region fallthrough
CT: control target
= control target key end

     0   :  { %s685_s18 = smov 0   ;;  %s797_s0 = inlined_call_operand.vmem [shape: f32[192,32], index: 0, kind: input, shape index: {}]   ;;  %s798_s1 = inlined_call_operand.vmem [shape: bf16[32,87], index: 1, kind: input, shape index: {}]   ;;  %s799_s2 = inlined_call_operand.vmem [shape: f32[1,87], index: 2, kind: input, shape index: {}]   ;;  %s800_s3 = inlined_call_operand.vmem [shape: bf16[64,23], index: 3, kind: input, shape index: {}]   ;;  %s801_s4 = inlined_call_operand.vmem [shape: f32[1,23], index: 4, kind: input, shape index: {}]   ;;  %s802_s5 = inlined_call_operand.vmem [shape: f32[192,23], index: 5, kind: output, shape index: {}]  }
   0x1 LB: > { %s578_s19 = sadd.s32 4294967295, %s652_s18   ;;  %p582_p0 = scmp.ge.s32.totalorder %s652_s18, 1  ;;  %s652_s18 = sphi %s685_s18, %s15_s18  }
   0x2   : > { %p188_p1 = scmp.lt.s32.totalorder %s652_s18, 3 }
   0x4   : > { %p189_p2 = pnand %p582_p0, %p188_p1 }
   0x5   : > { %s216_s22 = smul.u32 (!%p189_p2), 12, %s578_s19  ;;  %s654_s14 = smov (!%p189_p2), 64  }
   0x6   : > { %192 = sbr.rel (%p189_p2) target bundleno = 384 (0x180), region = 40 }
   0x7   : > { %p217_p3 = scmp.lt.s32.totalorder (!%p189_p2), %s216_s22, 23 }
   0xb   : > { %v624_v0 = vld [vmem:[%s798_s1 + $0x8] sm:$0xff]  ;;  %v623_v1 = vld [vmem:[%s798_s1] sm:$0xff]  ;;  %s804_s22 = smov (!%p217_p3, %s216_s22), 23  ;;  %vm279_vm0 = vcmask 261120   ;;  %v628_v32 = vld [vmem:[%s800_s3 + $0x18] sm:$0xff]  ;;  %vm391_vm1 = vcmask 523264  }
   0xc   : > { %304 = vmatpush.bf16.msra.mxu0 %v624_v0  ;;  %629 = vmatpush.bf16.msra.mxu3 %v624_v0  ;;  %s583_s25 = sshll.u32 %s804_s22, 3  ;;  %v627_v33 = vld [vmem:[%s800_s3 + $0x10] sm:$0xff]  ;;  %v626_v34 = vld [vmem:[%s800_s3 + $0x8] sm:$0xff]  ;;  %v625_v35 = vld [vmem:[%s800_s3] sm:$0xff]  ;;  %vm509_vm2 = vcmask 187392  }
   0xd   : > { %s707_s28 = scalar_lea.vmem %s797_s0, %s583_s25  ;;  %414 = vmatpush.bf16.msra.mxu1 %v628_v32  ;;  %631 = vmatpush.bf16.msra.mxu2 %v628_v32  ;;  %v644_v36 = vld [vmem:[%s799_s2] ss:$0 sm:$0xff]  ;;  %s768_s20 = scalar_lea.vmem %s802_s5, %s583_s25 }
   0xe   : > { %v229_v2 = vld [vmem:[%s707_s28] sm:$0xff]  ;;  %v230_v3 = vld [vmem:[%s707_s28 + $0x8] sm:$0xff]  ;;  %v231_v12 = vld [vmem:[%s707_s28 + $0x10] sm:$0xff] }
   0xf   : > { %v241_v4 = vmax.f32 %v229_v2, 0.0  ;;  %v242_v5 = vmax.f32 %v230_v3, 0.0  ;;  %v237_v6 = vld [vmem:[%s707_s28 + $0x40] sm:$0xff]  ;;  %v238_v7 = vld [vmem:[%s707_s28 + $0x48] sm:$0xff]  ;;  %v232_v13 = vld [vmem:[%s707_s28 + $0x18] sm:$0xff]  ;;  %v243_v14 = vmax.f32 %v231_v12, 0.0 }
  0x10   : > { %305 = vmatpush.bf16.msra.mxu0 %v623_v1  ;;  %630 = vmatpush.bf16.msra.mxu3 %v623_v1  ;;  %v249_v8 = vmax.f32 %v237_v6, 0.0  ;;  %v250_v9 = vmax.f32 %v238_v7, 0.0  ;;  %v244_v15 = vmax.f32 %v232_v13, 0.0  ;;  %v239_v17 = vld [vmem:[%s707_s28 + $0x50] sm:$0xff]  ;;  %v240_v18 = vld [vmem:[%s707_s28 + $0x58] sm:$0xff]  ;;  %v233_v22 = vld [vmem:[%s707_s28 + $0x20] sm:$0xff] }
  0x11   : > { %v253_v10 = vpack.c.bf16 %v242_v5, %v241_v4  ;;  %v251_v19 = vmax.f32 %v239_v17, 0.0  ;;  %v252_v20 = vmax.f32 %v240_v18, 0.0  ;;  %v234_v23 = vld [vmem:[%s707_s28 + $0x28] sm:$0xff]  ;;  %v245_v24 = vmax.f32 %v233_v22, 0.0  ;;  %v235_v27 = vld [vmem:[%s707_s28 + $0x30] sm:$0xff]  ;;  %v236_v28 = vld [vmem:[%s707_s28 + $0x38] sm:$0xff]  ;;  %415 = vmatpush.bf16.msra.mxu1 %v627_v33  ;;  %632 = vmatpush.bf16.msra.mxu2 %v627_v33 }
  0x12   : > { %v257_v11 = vpack.c.bf16 %v250_v9, %v249_v8  ;;  %v254_v16 = vpack.c.bf16 %v244_v15, %v243_v14  ;;  %v246_v25 = vmax.f32 %v234_v23, 0.0  ;;  %v247_v29 = vmax.f32 %v235_v27, 0.0  ;;  %v645_v15 = vld [vmem:[%s801_s4] ss:$0 sm:$0xff] }
  0x13   : > { %593 = vmatmul.msk.bf16.vlgmr.msra.gmra.mxu0 %vm279_vm0, %v253_v10  ;;  %v258_v21 = vpack.c.bf16 %v252_v20, %v251_v19  ;;  %v248_v30 = vmax.f32 %v236_v28, 0.0 }
  0x14   : > { %597 = vmatmul.msk.bf16.vlgmr.msra.gmra.mxu3 %vm279_vm0, %v257_v11  ;;  %v255_v26 = vpack.c.bf16 %v246_v25, %v245_v24 }
  0x15   : > { %v256_v31 = vpack.c.bf16 %v248_v30, %v247_v29  ;;  %416 = vmatpush.bf16.msra.mxu1 %v626_v34  ;;  %633 = vmatpush.bf16.msra.mxu2 %v626_v34 }
  0x19   : > { %417 = vmatpush.bf16.msra.mxu1 %v625_v35  ;;  %634 = vmatpush.bf16.msra.mxu2 %v625_v35 }
  0x23   : > { %594 = vmatmul.msk.bf16.gmra.mxu0 %vm279_vm0, %v254_v16 }
  0x24   : > { %598 = vmatmul.msk.bf16.gmra.mxu3 %vm279_vm0, %v258_v21 }
  0x33   : > { %595 = vmatmul.msk.bf16.gmra.mxu0 %vm279_vm0, %v255_v26 }
  0x43   : > { %596 = vmatmul.msk.bf16.gmra.mxu0 %vm279_vm0, %v256_v31 }
  0x90   : > { %v307_v37 = vpop.f32.mrf.mxu0 }
  0x91   : > { %v308_v38 = vadd.f32 %v644_v36, %v307_v37 }
  0x93   : > { %461 = vrot.lane.b32.xlu0 %v308_v38, %s654_s14  ;;  %v337_v43 = vmax.f32 %v308_v38, 0.0 }
  0x97   : > { %v327_v39 = vpop.f32.mrf.mxu3 }
  0x98   : > { %v309_v40 = vpop.f32.mrf.mxu0  ;;  %v328_v41 = vadd.f32 %v644_v36, %v327_v39 }
  0x99   : > { %v310_v42 = vadd.f32 %v644_v36, %v309_v40 }
  0x9a   : > { %477 = vrot.lane.b32.xlu2 %v328_v41, %s654_s14  ;;  %v345_v9 = vmax.f32 %v328_v41, 0.0 }
  0x9b   : > { %v338_v44 = vmax.f32 %v310_v42, 0.0  ;;  %463 = vrot.lane.b32.xlu0 %v310_v42, %s654_s14 }
  0x9d   : > { %v349_v45 = vpack.c.bf16 %v338_v44, %v337_v43 }
  0x9f   : > { %615 = vmatmul.msk.bf16.vlgmr.msra.gmra.mxu1 %vm391_vm1, %v349_v45  ;;  %v329_v53 = vpop.f32.mrf.mxu3 }
  0xa0   : > { %v312_v46 = vpop.f32.mrf.mxu0  ;;  %v330_v2 = vadd.f32 %v644_v36, %v329_v53 }
  0xa1   : > { %v313_v47 = vadd.f32 %v644_v36, %v312_v46 }
  0xa2   : > { %v346_v10 = vmax.f32 %v330_v2, 0.0 }
  0xa3   : > { %465 = vrot.lane.b32.xlu1 %v313_v47, %s654_s14  ;;  %v339_v50 = vmax.f32 %v313_v47, 0.0 }
  0xa4   : > { %v353_v11 = vpack.c.bf16 %v346_v10, %v345_v9 }
  0xa7   : > { %v332_v56 = vpop.f32.mrf.mxu3 }
  0xa8   : > { %v314_v48 = vpop.f32.mrf.mxu0  ;;  %v333_v8 = vadd.f32 %v644_v36, %v332_v56 }
  0xa9   : > { %v315_v49 = vadd.f32 %v644_v36, %v314_v48 }
  0xaa   : > { %v347_v12 = vmax.f32 %v333_v8, 0.0 }
  0xab   : > { %v340_v51 = vmax.f32 %v315_v49, 0.0  ;;  %467 = vrot.lane.b32.xlu1 %v315_v49, %s654_s14 }
  0xad   : > { %v350_v52 = vpack.c.bf16 %v340_v51, %v339_v50 }
  0xaf   : > { %616 = vmatmul.msk.bf16.gmra.mxu1 %vm391_vm1, %v350_v52  ;;  %v334_v62 = vpop.f32.mrf.mxu3 }
  0xb0   : > { %v317_v54 = vpop.f32.mrf.mxu0  ;;  %v335_v0 = vadd.f32 %v644_v36, %v334_v62 }
  0xb1   : > { %v318_v55 = vadd.f32 %v644_v36, %v317_v54 }
  0xb2   : > { %v348_v13 = vmax.f32 %v335_v0, 0.0 }
  0xb3   : > { %469 = vrot.lane.b32.xlu2 %v318_v55, %s654_s14  ;;  %v341_v59 = vmax.f32 %v318_v55, 0.0 }
  0xb4   : > { %v354_v14 = vpack.c.bf16 %v348_v13, %v347_v12 }
  0xb8   : > { %v319_v57 = vpop.f32.mrf.mxu0 }
  0xb9   : > { %v320_v58 = vadd.f32 %v644_v36, %v319_v57 }
  0xbb   : > { %v342_v60 = vmax.f32 %v320_v58, 0.0  ;;  %471 = vrot.lane.b32.xlu2 %v320_v58, %s654_s14 }
  0xbd   : > { %v351_v61 = vpack.c.bf16 %v342_v60, %v341_v59 }
  0xbf   : > { %617 = vmatmul.msk.bf16.gmra.mxu1 %vm391_vm1, %v351_v61 }
  0xc0   : > { %v322_v63 = vpop.f32.mrf.mxu0 }
  0xc1   : > { %v323_v1 = vadd.f32 %v644_v36, %v322_v63 }
  0xc3   : > { %473 = vrot.lane.b32.xlu0 %v323_v1, %s654_s14  ;;  %483 = vrot.lane.b32.xlu2 %v335_v0, %s654_s14  ;;  %v343_v5 = vmax.f32 %v323_v1, 0.0 }
  0xc8   : > { %v324_v3 = vpop.f32.mrf.mxu0 }
  0xc9   : > { %v325_v4 = vadd.f32 %v644_v36, %v324_v3 }
  0xcb   : > { %v344_v6 = vmax.f32 %v325_v4, 0.0  ;;  %475 = vrot.lane.b32.xlu1 %v325_v4, %s654_s14  ;;  %479 = vrot.lane.b32.xlu0 %v330_v2, %s654_s14 }
  0xcd   : > { %v352_v7 = vpack.c.bf16 %v344_v6, %v343_v5 }
  0xcf   : > { %618 = vmatmul.msk.bf16.vlgmr.msra.gmra.mxu2 %vm391_vm1, %v352_v7 }
  0xd3   : > { %481 = vrot.lane.b32.xlu1 %v333_v8, %s654_s14 }
  0xdf   : > { %619 = vmatmul.msk.bf16.gmra.mxu2 %vm391_vm1, %v353_v11 }
  0xef   : > { %620 = vmatmul.msk.bf16.gmra.mxu2 %vm391_vm1, %v354_v14 }
  0xf4   : > { %v478_v28 = vpop.permute.xlu2 %477 }
 0x105   : > { %v462_v16 = vpop.permute.xlu0 %461 }
 0x10d   : > { %v464_v22 = vpop.permute.xlu0 %463  ;;  %v470_v33 = vpop.permute.xlu2 %469 }
 0x115   : > { %v466_v24 = vpop.permute.xlu1 %465  ;;  %v472_v39 = vpop.permute.xlu2 %471 }
 0x11c   : > { %v419_v17 = vpop.f32.mrf.mxu1 }
 0x11d   : > { %v420_v18 = vadd.f32 %v645_v15, %v419_v17  ;;  %v468_v31 = vpop.permute.xlu1 %467  ;;  %v484_v62 = vpop.permute.xlu2 %483 }
 0x11f   : > { %v497_v19 = vadd.f32 %v462_v16, %v420_v18 }
 0x121   : > { %510 = vst.msk [vmem:[%s768_s20] sm:$0xff] %vm509_vm2, %v497_v19 }
 0x124   : > { %v421_v20 = vpop.f32.mrf.mxu1 }
 0x125   : > { %v422_v21 = vadd.f32 %v645_v15, %v421_v20 }
 0x127   : > { %v498_v23 = vadd.f32 %v464_v22, %v422_v21 }
 0x129   : > { %511 = vst.msk [vmem:[%s768_s20 + $0x8] sm:$0xff] %vm509_vm2, %v498_v23 }
 0x12c   : > { %v424_v25 = vpop.f32.mrf.mxu1 }
 0x12d   : > { %v425_v26 = vadd.f32 %v645_v15, %v424_v25 }
 0x12f   : > { %v499_v27 = vadd.f32 %v466_v24, %v425_v26 }
 0x131   : > { %512 = vst.msk [vmem:[%s768_s20 + $0x10] sm:$0xff] %vm509_vm2, %v499_v27 }
 0x134   : > { %v426_v29 = vpop.f32.mrf.mxu1 }
 0x135   : > { %v427_v30 = vadd.f32 %v645_v15, %v426_v29  ;;  %v474_v43 = vpop.permute.xlu0 %473 }
 0x137   : > { %v500_v32 = vadd.f32 %v468_v31, %v427_v30 }
 0x139   : > { %513 = vst.msk [vmem:[%s768_s20 + $0x18] sm:$0xff] %vm509_vm2, %v500_v32 }
 0x13c   : > { %v429_v34 = vpop.f32.mrf.mxu1 }
 0x13d   : > { %v430_v35 = vadd.f32 %v645_v15, %v429_v34  ;;  %v476_v47 = vpop.permute.xlu1 %475  ;;  %v480_v54 = vpop.permute.xlu0 %479 }
 0x13f   : > { %v501_v36 = vadd.f32 %v470_v33, %v430_v35 }
 0x141   : > { %514 = vst.msk [vmem:[%s768_s20 + $0x20] sm:$0xff] %vm509_vm2, %v501_v36 }
 0x144   : > { %v431_v37 = vpop.f32.mrf.mxu1 }
 0x145   : > { %v432_v38 = vadd.f32 %v645_v15, %v431_v37  ;;  %v482_v58 = vpop.permute.xlu1 %481 }
 0x147   : > { %v502_v40 = vadd.f32 %v472_v39, %v432_v38 }
 0x149   : > { %515 = vst.msk [vmem:[%s768_s20 + $0x28] sm:$0xff] %vm509_vm2, %v502_v40 }
 0x152   : > { %v434_v41 = vpop.f32.mrf.mxu2 }
 0x153   : > { %v435_v42 = vadd.f32 %v645_v15, %v434_v41 }
 0x155   : > { %v503_v44 = vadd.f32 %v474_v43, %v435_v42 }
 0x157   : > { %516 = vst.msk [vmem:[%s768_s20 + $0x30] sm:$0xff] %vm509_vm2, %v503_v44 }
 0x15a   : > { %v436_v45 = vpop.f32.mrf.mxu2 }
 0x15b   : > { %v437_v46 = vadd.f32 %v645_v15, %v436_v45 }
 0x15d   : > { %v504_v48 = vadd.f32 %v476_v47, %v437_v46 }
 0x15f   : > { %517 = vst.msk [vmem:[%s768_s20 + $0x38] sm:$0xff] %vm509_vm2, %v504_v48 }
 0x162   : > { %v439_v49 = vpop.f32.mrf.mxu2 }
 0x163   : > { %v440_v50 = vadd.f32 %v645_v15, %v439_v49 }
 0x165   : > { %v505_v51 = vadd.f32 %v478_v28, %v440_v50 }
 0x167   : > { %518 = vst.msk [vmem:[%s768_s20 + $0x40] sm:$0xff] %vm509_vm2, %v505_v51 }
 0x16a   : > { %v441_v52 = vpop.f32.mrf.mxu2 }
 0x16b   : > { %v442_v53 = vadd.f32 %v645_v15, %v441_v52 }
 0x16d   : > { %v506_v55 = vadd.f32 %v480_v54, %v442_v53 }
 0x16f   : > { %519 = vst.msk [vmem:[%s768_s20 + $0x48] sm:$0xff] %vm509_vm2, %v506_v55 }
 0x172   : > { %v444_v56 = vpop.f32.mrf.mxu2 }
 0x173   : > { %v445_v57 = vadd.f32 %v645_v15, %v444_v56 }
 0x175   : > { %v507_v59 = vadd.f32 %v482_v58, %v445_v57 }
 0x177   : > { %520 = vst.msk [vmem:[%s768_s20 + $0x50] sm:$0xff] %vm509_vm2, %v507_v59 }
 0x17a   : > { %v446_v60 = vpop.f32.mrf.mxu2 }
 0x17b   : > { %v447_v61 = vadd.f32 %v645_v15, %v446_v60 }
 0x17d   : > { %v508_v63 = vadd.f32 %v484_v62, %v447_v61 }
 0x17f   : > { %521 = vst.msk [vmem:[%s768_s20 + $0x58] sm:$0xff] %vm509_vm2, %v508_v63 }
 0x180 PF: > { %s15_s18 = sadd.s32 1, %s652_s18  }
 0x181   : > { %p12_p4 = scmp.ge.s32.totalorder %s15_s18, 4  }
 0x183   :  { %14 = sbr.rel (!%p12_p4) target bundleno = 1 (0x1), region = 70 }

</bundles_post_ra>
